<compile_context>
chip_gen: v7x
topology: tpu7x:2x2x1
jax: 0.10.0
libtpu: 0.0.40
codegen_flags: <defaults>
</compile_context>

<pallas_src>
import functools

import numpy as np
import jax
import jax.numpy as jnp
from jax.experimental import pallas as pl
from jax.experimental.pallas import tpu as pltpu

NEG_SLOPE = 0.01   # torch.nn.LeakyReLU default
HIDDEN = 256


def _leaky_relu(x):
    return jnp.where(x > 0, x, NEG_SLOPE * x)


def _round_up(x, m):
    return (x + m - 1) // m * m


def _cdiv(a, b):
    return -(-a // b)


def _num_tensorcores():
    """Best-effort TensorCore-per-chip count (v7x / megacore -> 2, else 1)."""
    try:
        info = pltpu.get_tpu_info()
        for attr in ("num_cores", "num_tensorcores", "tensor_cores_per_chip",
                     "cores_per_chip"):
            n = getattr(info, attr, None)
            if n:
                return int(n)
    except Exception:
        pass
    try:
        kind = jax.devices()[0].device_kind.lower()
    except Exception:
        return 1
    if "v7" in kind or "7x" in kind:
        return 2
    if ("v4" in kind or "v5p" in kind) and "lite" not in kind:
        return 2   # megacore generations
    return 1


def _physical_vmem_bytes():
    try:
        return int(pltpu.get_tpu_info().vmem_capacity_bytes)
    except Exception:
        return 64 * 1024 * 1024   # conservative (v7x per-TC VMEM)


def _resident_spec(shape):
    """Full block every grid step; single-buffer it when the API allows."""
    try:
        return pl.BlockSpec(shape, lambda i: (0, 0),
                            pipeline_mode=pl.Buffered(1))
    except (TypeError, AttributeError):
        return pl.BlockSpec(shape, lambda i: (0, 0))


def posemap_kernel(x_ref, w1_ref, b1_ref, w2_ref, b2_ref, w3_ref, b3_ref, o_ref):
    """Fused 3-layer MLP: weights resident in VMEM, one batch tile per grid step.

    Matmuls run with mm_dtype (bf16 by default) inputs + f32 accumulation on
    the MXU; bias add and LeakyReLU stay in f32 on the VPU.
    """
    mm_dtype = w1_ref.dtype

    x = x_ref[...].astype(mm_dtype)
    h1 = jnp.dot(x, w1_ref[...], preferred_element_type=jnp.float32) + b1_ref[...]
    h1 = _leaky_relu(h1)

    h2 = jnp.dot(h1.astype(mm_dtype), w2_ref[...],
                 preferred_element_type=jnp.float32) + b2_ref[...]
    h2 = _leaky_relu(h2)

    out = jnp.dot(h2.astype(mm_dtype), w3_ref[...],
                  preferred_element_type=jnp.float32) + b3_ref[...]
    o_ref[...] = out.astype(o_ref.dtype)


def prepare_params(params, mm_dtype=jnp.bfloat16):
    """One-time weight prep; hoists the per-call casts out of the forward path."""
    return {
        "w1": params["w1"].astype(mm_dtype), "b1": params["b1"].astype(jnp.float32),
        "w2": params["w2"].astype(mm_dtype), "b2": params["b2"].astype(jnp.float32),
        "w3": params["w3"].astype(mm_dtype), "b3": params["b3"].astype(jnp.float32),
    }


@functools.partial(jax.jit, static_argnames=("block_b", "mm_dtype"))
def posemap_forward(x, params, block_b=2048, mm_dtype=jnp.bfloat16):
    """x: [B, input_num] f32.  params: w1/w2/w3 as [in, out], b1/b2/b3 as [1, out]."""
    B, in_dim = x.shape
    hid = params["w1"].shape[1]
    out_dim = params["w3"].shape[1]

    # --- weight / bias prep (no-op casts if prepare_params() was used) ------
    w1 = params["w1"].astype(mm_dtype)
    w2 = params["w2"].astype(mm_dtype)
    w3 = params["w3"].astype(mm_dtype)
    b1 = params["b1"].astype(jnp.float32)
    b2 = params["b2"].astype(jnp.float32)
    b3 = params["b3"].astype(jnp.float32)

    # --- batch tiling: near-equal tiles, generation-aware split -------------
    n_tc = _num_tensorcores()
    b8 = _round_up(max(B, 1), 8)
    n_steps = max(1, _cdiv(b8, block_b))
    if n_tc > 1 and b8 >= n_tc * 8:
        # Shard the "parallel" batch axis evenly across TensorCores (v7x).
        n_steps = _round_up(max(n_steps, n_tc), n_tc)
    eff_b = min(block_b, _round_up(_cdiv(b8, n_steps), 8))
    grid_steps = _cdiv(b8, eff_b)
    if n_tc > 1 and grid_steps > 1:
        grid_steps = _round_up(grid_steps, n_tc)
    b_padded = grid_steps * eff_b
    x_p = x if b_padded == B else jnp.pad(x, ((0, b_padded - B), (0, 0)))
    grid = (grid_steps,)

    # --- scoped-VMEM estimate; raise the limit only for very large tiles ----
    mm_bytes = jnp.dtype(mm_dtype).itemsize
    vmem_est = (
        2 * eff_b * in_dim * x.dtype.itemsize                     # x tile (x2 buf)
        + 2 * eff_b * out_dim * 4                                 # out tile (x2 buf)
        + (in_dim * hid + hid * hid + hid * out_dim) * mm_bytes   # resident weights
        + (2 * hid + out_dim) * 4                                 # biases
        + 2 * eff_b * hid * (4 + mm_bytes)                        # h1/h2 f32 + casts
    )
    cp_kwargs = dict(dimension_semantics=("parallel",))
    if vmem_est > 12 * 1024 * 1024:
        cap = (3 * _physical_vmem_bytes()) // 4
        cp_kwargs["vmem_limit_bytes"] = int(min(2 * vmem_est, cap))

    out_p = pl.pallas_call(
        posemap_kernel,
        out_shape=jax.ShapeDtypeStruct((b_padded, out_dim), x.dtype),
        grid_spec=pltpu.PrefetchScalarGridSpec(
            num_scalar_prefetch=0,
            grid=grid,
            in_specs=[
                pl.BlockSpec((eff_b, in_dim), lambda i: (i, 0)),  # x tile
                _resident_spec((in_dim, hid)),    # w1
                _resident_spec((1, hid)),         # b1
                _resident_spec((hid, hid)),       # w2
                _resident_spec((1, hid)),         # b2
                _resident_spec((hid, out_dim)),   # w3 (unpadded last dim)
                _resident_spec((1, out_dim)),     # b3
            ],
            # Unpadded output block: block last dim == array last dim (legal),
            # avoids the 8x-padded f32 output write and the post-kernel slice.
            out_specs=pl.BlockSpec((eff_b, out_dim), lambda i: (i, 0)),
        ),
        compiler_params=pltpu.CompilerParams(**cp_kwargs),
    )(x_p, w1, b1, w2, b2, w3, b3)

    return out_p if b_padded == B else out_p[:B]


def init_params(key, input_num, output_num, hidden=HIDDEN):
    """Deterministic PyTorch-like uniform init; weights stored as [in, out]."""
    ks = jax.random.split(key, 6)

    def lin(kw, kb, fan_in, fan_out):
        bound = 1.0 / float(np.sqrt(fan_in))
        w = jax.random.uniform(kw, (fan_in, fan_out), jnp.float32, -bound, bound)
        b = jax.random.uniform(kb, (1, fan_out), jnp.float32, -bound, bound)
        return w, b

    w1, b1 = lin(ks[0], ks[1], input_num, hidden)
    w2, b2 = lin(ks[2], ks[3], hidden, hidden)
    w3, b3 = lin(ks[4], ks[5], hidden, output_num)
    return {"w1": w1, "b1": b1, "w2": w2, "b2": b2, "w3": w3, "b3": b3}


def posemap_reference(x, params):
    h1 = _leaky_relu(x @ params["w1"] + params["b1"])
    h2 = _leaky_relu(h1 @ params["w2"] + params["b2"])
    return h2 @ params["w3"] + params["b3"]


if __name__ == "__main__":
    key = jax.random.PRNGKey(0)
    k_x, k_p, k_x2 = jax.random.split(key, 3)

    batch, input_num, output_num = 64, 32, 16
    x = jax.random.normal(k_x, (batch, input_num), jnp.float32)
    params = init_params(k_p, input_num, output_num)

    ref = posemap_reference(x, params)

    # Exact-semantics path (f32 MXU inputs): tight check.
    out_f32 = jax.block_until_ready(posemap_forward(x, params, mm_dtype=jnp.float32))
    assert out_f32.shape == (batch, output_num)
    assert jnp.allclose(out_f32, ref, atol=1e-4, rtol=1e-4), "f32 path mismatch"

    # Fast path (bf16 MXU inputs, f32 accumulation), with weights prepared once.
    prep = prepare_params(params, jnp.bfloat16)
    out_bf16 = jax.block_until_ready(posemap_forward(x, prep))
    assert out_bf16.shape == (batch, output_num)
    assert jnp.allclose(out_bf16, ref, atol=1e-1, rtol=1e-1), "bf16 path mismatch"

    # Multi-tile path (forces grid > 1 and batch padding) to exercise tiling.
    x2 = jax.random.normal(k_x2, (200, input_num), jnp.float32)
    ref2 = posemap_reference(x2, params)
    out2 = jax.block_until_ready(
        posemap_forward(x2, params, block_b=64, mm_dtype=jnp.float32))
    assert out2.shape == (200, output_num)
    assert jnp.allclose(out2, ref2, atol=1e-4, rtol=1e-4), "multi-tile mismatch"

    print("KERNEL_OK")
</pallas_src>

<mosaic_0001>
module attributes {stable_mosaic.version = 11 : i64} {
  func.func @posemap_kernel(%arg0: i32, %arg1: memref<64x32xf32, #tpu.memory_space<vmem>>, %arg2: memref<32x256xf32, #tpu.memory_space<vmem>>, %arg3: memref<1x256xf32, #tpu.memory_space<vmem>>, %arg4: memref<256x256xf32, #tpu.memory_space<vmem>>, %arg5: memref<1x256xf32, #tpu.memory_space<vmem>>, %arg6: memref<256x16xf32, #tpu.memory_space<vmem>>, %arg7: memref<1x16xf32, #tpu.memory_space<vmem>>, %arg8: memref<64x16xf32, #tpu.memory_space<vmem>>) attributes {dimension_semantics = [#tpu.dimension_semantics<parallel>], iteration_bounds = array<i64: 1>, scalar_prefetch = 0 : i64, scratch_operands = 0 : i64, tpu.core_type = #tpu.core_type<tc>, window_params = [{transform_indices = @transform_0, window_bounds = array<i64: 64, 32>}, {pipeline_mode = #tpu.pipeline_mode<synchronous>, transform_indices = @transform_1, window_bounds = array<i64: 32, 256>}, {pipeline_mode = #tpu.pipeline_mode<synchronous>, transform_indices = @transform_2, window_bounds = array<i64: 1, 256>}, {pipeline_mode = #tpu.pipeline_mode<synchronous>, transform_indices = @transform_3, window_bounds = array<i64: 256, 256>}, {pipeline_mode = #tpu.pipeline_mode<synchronous>, transform_indices = @transform_4, window_bounds = array<i64: 1, 256>}, {pipeline_mode = #tpu.pipeline_mode<synchronous>, transform_indices = @transform_5, window_bounds = array<i64: 256, 16>}, {pipeline_mode = #tpu.pipeline_mode<synchronous>, transform_indices = @transform_6, window_bounds = array<i64: 1, 16>}, {transform_indices = @transform_7, window_bounds = array<i64: 64, 16>}]} {
    %c0 = arith.constant 0 : index
    %c0_0 = arith.constant 0 : index
    %0 = vector.load %arg1[%c0, %c0_0] : memref<64x32xf32, #tpu.memory_space<vmem>>, vector<64x32xf32>
    %c0_1 = arith.constant 0 : index
    %c0_2 = arith.constant 0 : index
    %1 = vector.load %arg2[%c0_1, %c0_2] : memref<32x256xf32, #tpu.memory_space<vmem>>, vector<32x256xf32>
    %cst = arith.constant dense<0.000000e+00> : vector<64x256xf32>
    %2 = tpu.matmul %0, %1, %cst {dimension_numbers = #tpu.dot_dimension_numbers<[1], [0], [0], [1], [0, 0, 1, 1], [], []>} : vector<64x32xf32>, vector<32x256xf32>, vector<64x256xf32> -> vector<64x256xf32>
    %c0_3 = arith.constant 0 : index
    %c0_4 = arith.constant 0 : index
    %3 = vector.load %arg3[%c0_3, %c0_4] : memref<1x256xf32, #tpu.memory_space<vmem>>, vector<1x256xf32>
    %4 = vector.broadcast %3 : vector<1x256xf32> to vector<64x256xf32>
    %5 = arith.addf %2, %4 : vector<64x256xf32>
    %cst_5 = arith.constant 0.000000e+00 : f32
    %6 = vector.broadcast %cst_5 : f32 to vector<64x256xf32>
    %7 = arith.cmpf ogt, %5, %6 : vector<64x256xf32>
    %cst_6 = arith.constant 0.00999999977 : f32
    %8 = vector.broadcast %cst_6 : f32 to vector<64x256xf32>
    %9 = arith.mulf %8, %5 : vector<64x256xf32>
    %10 = arith.select %7, %5, %9 : vector<64x256xi1>, vector<64x256xf32>
    %c0_7 = arith.constant 0 : index
    %c0_8 = arith.constant 0 : index
    %11 = vector.load %arg4[%c0_7, %c0_8] : memref<256x256xf32, #tpu.memory_space<vmem>>, vector<256x256xf32>
    %cst_9 = arith.constant dense<0.000000e+00> : vector<64x256xf32>
    %12 = tpu.matmul %10, %11, %cst_9 {dimension_numbers = #tpu.dot_dimension_numbers<[1], [0], [0], [1], [0, 0, 1, 1], [], []>} : vector<64x256xf32>, vector<256x256xf32>, vector<64x256xf32> -> vector<64x256xf32>
    %c0_10 = arith.constant 0 : index
    %c0_11 = arith.constant 0 : index
    %13 = vector.load %arg5[%c0_10, %c0_11] : memref<1x256xf32, #tpu.memory_space<vmem>>, vector<1x256xf32>
    %14 = vector.broadcast %13 : vector<1x256xf32> to vector<64x256xf32>
    %15 = arith.addf %12, %14 : vector<64x256xf32>
    %cst_12 = arith.constant 0.000000e+00 : f32
    %16 = vector.broadcast %cst_12 : f32 to vector<64x256xf32>
    %17 = arith.cmpf ogt, %15, %16 : vector<64x256xf32>
    %cst_13 = arith.constant 0.00999999977 : f32
    %18 = vector.broadcast %cst_13 : f32 to vector<64x256xf32>
    %19 = arith.mulf %18, %15 : vector<64x256xf32>
    %20 = arith.select %17, %15, %19 : vector<64x256xi1>, vector<64x256xf32>
    %c0_14 = arith.constant 0 : index
    %c0_15 = arith.constant 0 : index
    %21 = vector.load %arg6[%c0_14, %c0_15] : memref<256x16xf32, #tpu.memory_space<vmem>>, vector<256x16xf32>
    %cst_16 = arith.constant dense<0.000000e+00> : vector<64x16xf32>
    %22 = tpu.matmul %20, %21, %cst_16 {dimension_numbers = #tpu.dot_dimension_numbers<[1], [0], [0], [1], [0, 0, 1, 1], [], []>} : vector<64x256xf32>, vector<256x16xf32>, vector<64x16xf32> -> vector<64x16xf32>
    %c0_17 = arith.constant 0 : index
    %c0_18 = arith.constant 0 : index
    %23 = vector.load %arg7[%c0_17, %c0_18] : memref<1x16xf32, #tpu.memory_space<vmem>>, vector<1x16xf32>
    %24 = vector.broadcast %23 : vector<1x16xf32> to vector<64x16xf32>
    %25 = arith.addf %22, %24 : vector<64x16xf32>
    %c0_19 = arith.constant 0 : index
    %c0_20 = arith.constant 0 : index
    %26 = vector.load %arg8[%c0_19, %c0_20] : memref<64x16xf32, #tpu.memory_space<vmem>>, vector<64x16xf32>
    tpu.vector_store %arg8[%c0_19, %c0_20], %25 {strides = array<i32>} : memref<64x16xf32, #tpu.memory_space<vmem>>, vector<64x16xf32>,
    return
  }
  func.func @transform_0(%arg0: i32) -> (i32, i32) {
    %c0_i32 = arith.constant 0 : i32
    %c0_i32_0 = arith.constant 0 : i32
    return %arg0, %c0_i32 : i32, i32
  }
  func.func @transform_1(%arg0: i32) -> (i32, i32) {
    %c0_i32 = arith.constant 0 : i32
    %c0_i32_0 = arith.constant 0 : i32
    %c0_i32_1 = arith.constant 0 : i32
    return %c0_i32, %c0_i32_0 : i32, i32
  }
  func.func @transform_2(%arg0: i32) -> (i32, i32) {
    %c0_i32 = arith.constant 0 : i32
    %c0_i32_0 = arith.constant 0 : i32
    %c0_i32_1 = arith.constant 0 : i32
    return %c0_i32, %c0_i32_0 : i32, i32
  }
  func.func @transform_3(%arg0: i32) -> (i32, i32) {
    %c0_i32 = arith.constant 0 : i32
    %c0_i32_0 = arith.constant 0 : i32
    %c0_i32_1 = arith.constant 0 : i32
    return %c0_i32, %c0_i32_0 : i32, i32
  }
  func.func @transform_4(%arg0: i32) -> (i32, i32) {
    %c0_i32 = arith.constant 0 : i32
    %c0_i32_0 = arith.constant 0 : i32
    %c0_i32_1 = arith.constant 0 : i32
    return %c0_i32, %c0_i32_0 : i32, i32
  }
  func.func @transform_5(%arg0: i32) -> (i32, i32) {
    %c0_i32 = arith.constant 0 : i32
    %c0_i32_0 = arith.constant 0 : i32
    %c0_i32_1 = arith.constant 0 : i32
    return %c0_i32, %c0_i32_0 : i32, i32
  }
  func.func @transform_6(%arg0: i32) -> (i32, i32) {
    %c0_i32 = arith.constant 0 : i32
    %c0_i32_0 = arith.constant 0 : i32
    %c0_i32_1 = arith.constant 0 : i32
    return %c0_i32, %c0_i32_0 : i32, i32
  }
  func.func @transform_7(%arg0: i32) -> (i32, i32) {
    %c0_i32 = arith.constant 0 : i32
    %c0_i32_0 = arith.constant 0 : i32
    return %arg0, %c0_i32 : i32, i32
  }
}

</mosaic_0001>

<bundles_post_ra>
// kernel: posemap_forward.1
= control target key start
LH: loop header
LB: loop body
LE: loop exit
PB: predicated region body
PF: predicated region fallthrough
CT: control target
= control target key end

     0   :  { %12 = vsyncpa [#allocation3], 0  ;;  %s846_s24 = smov [#allocation2]   ;;  %s1155_s0 = inlined_call_operand.vmem [shape: f32[64,32], index: 0, kind: input, shape index: {}]   ;;  %s1156_s1 = inlined_call_operand.vmem [shape: f32[32,256], index: 1, kind: input, shape index: {}]   ;;  %s1157_s2 = inlined_call_operand.vmem [shape: f32[1,256], index: 2, kind: input, shape index: {}]   ;;  %s1158_s3 = inlined_call_operand.hbm [shape: f32[256,256], index: 3, kind: input, shape index: {}]   ;;  %s1159_s4 = inlined_call_operand.vmem [shape: f32[1,256], index: 4, kind: input, shape index: {}]   ;;  %s1160_s5 = inlined_call_operand.vmem [shape: f32[256,16], index: 5, kind: input, shape index: {}]   ;;  %s1161_s6 = inlined_call_operand.vmem [shape: f32[1,16], index: 6, kind: input, shape index: {}]   ;;  %s1162_s7 = inlined_call_operand.vmem [shape: f32[64,16], index: 7, kind: output, shape index: {}]  }
   0x1   :  { %s24_s25 = sshll.u32 %s846_s24, 4  ;;  %s822_s28 = scalar_lea.hbm %s1158_s3, 8192  ;;  %s25_s25 = int_to_ptr.vmem [resolvable:$true] %s24_s25 }
   0x2   :  { %p823_p0 = scmp.ne.s32.totalorder %s1158_s3, %s822_s28  ;;  %p826_p1 = scmp.lt.u32.totalorder %s822_s28, %s1158_s3 }
   0x4   :  { %p828_p2 = pnand %p826_p1, %p823_p0 }
   0x6   :  { %831 = shalt.err (!%p828_p2)
}
   0x7   :  { %s832_s10 = scalar_lea.vmem %s25_s25, 8192  ;;  %p837_p4 = scmp.lt.s32.totalorder %s25_s25, %s25_s25 }
   0x8   :  { %p833_p3 = scmp.ne.s32.totalorder %s25_s25, %s832_s10  ;;  %p838_p5 = scmp.lt.s32.totalorder %s832_s10, %s832_s10 }
   0xa   :  { %p839_p6 = por %p838_p5, %p837_p4 }
   0xc   :  { %p840_p7 = pnand %p839_p6, %p833_p3 }
   0xe   :  { %843 = shalt.err (!%p840_p7)
}
   0xf   :  { %s847_s11 = smov 256   ;;  %s848_s12 = smov 16  }
  0x10   :  { %30 = dma.hbm_to_vmem [thread:$0]  %s1158_s3, 8192, %s25_s25, [#allocation3], %s847_s11, %s847_s11, %s848_s12  }
  0x11   :  { %844 = dma.done.wait [#allocation3], 8192  }
  0x12   :  { %845 = vsyncadd [#allocation3], 4294959104  ;;  %v849_v0 = vmov 0.0   ;;  %v49_v1 = vld [vmem:[%s1156_s1 + $0x8] sm:$0xff]  ;;  %v51_v2 = vld [vmem:[%s1156_s1 + $0x18] sm:$0xff]  ;;  %vm68_vm0 = vcmask 261120  }
  0x13   :  { %157 = vmatprep.mubr.f32.mxu0 %v849_v0  ;;  %v48_v3 = vld [vmem:[%s1156_s1] sm:$0xff]  ;;  %v714_v4 = vpack.c.bf16 %v51_v2, %v49_v1  ;;  %v50_v5 = vld [vmem:[%s1156_s1 + $0x10] sm:$0xff]  ;;  %v53_v6 = vld [vmem:[%s1156_s1 + $0x28] sm:$0xff] }
  0x14   :  { %v55_v7 = vld [vmem:[%s1156_s1 + $0x38] sm:$0xff]  ;;  %v716_v8 = vpack.c.bf16 %v50_v5, %v48_v3  ;;  %v52_v10 = vld [vmem:[%s1156_s1 + $0x20] sm:$0xff]  ;;  %v54_v11 = vld [vmem:[%s1156_s1 + $0x30] sm:$0xff] }
  0x15   :  { %v718_v9 = vpack.c.bf16 %v55_v7, %v53_v6  ;;  %715 = vmatprep.subr.bf16.mxu0 %v714_v4  ;;  %v720_v12 = vpack.c.bf16 %v54_v11, %v52_v10  ;;  %v255_v13 = vld [vmem:[#allocation2 + $0x8] sm:$0xff]  ;;  %v257_v14 = vld [vmem:[#allocation2 + $0x18] sm:$0xff]  ;;  %v254_v16 = vld [vmem:[#allocation2] sm:$0xff] }
  0x16   :  { %717 = vmatpush1.bf16.msra.mxu0 %v716_v8  ;;  %v722_v15 = vpack.c.bf16 %v257_v14, %v255_v13  ;;  %v256_v17 = vld [vmem:[#allocation2 + $0x10] sm:$0xff]  ;;  %v259_v18 = vld [vmem:[#allocation2 + $0x28] sm:$0xff]  ;;  %v261_v20 = vld [vmem:[#allocation2 + $0x38] sm:$0xff] }
  0x17   :  { %719 = vmatprep.subr.bf16.mxu0 %v718_v9  ;;  %v724_v19 = vpack.c.bf16 %v256_v17, %v254_v16  ;;  %v258_v21 = vld [vmem:[#allocation2 + $0x20] sm:$0xff]  ;;  %v260_v22 = vld [vmem:[#allocation2 + $0x30] sm:$0xff]  ;;  %v726_v24 = vpack.c.bf16 %v261_v20, %v259_v18  ;;  %v263_v25 = vld [vmem:[#allocation2 + $0x48] sm:$0xff] }
  0x18   :  { %v40_v23 = vld [vmem:[%s1155_s0] sm:$0xff]  ;;  %723 = vmatprep.subr.bf16.mxu1 %v722_v15  ;;  %v265_v26 = vld [vmem:[#allocation2 + $0x58] sm:$0xff]  ;;  %v728_v27 = vpack.c.bf16 %v260_v22, %v258_v21  ;;  %v264_v30 = vld [vmem:[#allocation2 + $0x50] sm:$0xff] }
  0x19   :  { %725 = vmatpush1.bf16.msra.mxu1 %v724_v19  ;;  %v730_v28 = vpack.c.bf16 %v265_v26, %v263_v25  ;;  %v262_v29 = vld [vmem:[#allocation2 + $0x40] sm:$0xff]  ;;  %v267_v31 = vld [vmem:[#allocation2 + $0x68] sm:$0xff]  ;;  %v269_v32 = vld [vmem:[#allocation2 + $0x78] sm:$0xff] }
  0x1a   :  { %721 = vmatpush1.bf16.msra.mxu0 %v720_v12  ;;  %727 = vmatprep.subr.bf16.mxu1 %v726_v24  ;;  %v41_v33 = vld [vmem:[%s1155_s0 + $0x8] sm:$0xff]  ;;  %v732_v34 = vpack.c.bf16 %v264_v30, %v262_v29  ;;  %v734_v35 = vpack.c.bf16 %v269_v32, %v267_v31  ;;  %v266_v36 = vld [vmem:[#allocation2 + $0x60] sm:$0xff]  ;;  %v268_v37 = vld [vmem:[#allocation2 + $0x70] sm:$0xff] }
  0x1b   :  { %v271_v38 = vld [vmem:[#allocation2 + $0x88] sm:$0xff]  ;;  %v273_v39 = vld [vmem:[#allocation2 + $0x98] sm:$0xff]  ;;  %v42_v40 = vld [vmem:[%s1155_s0 + $0x10] sm:$0xff]  ;;  %v736_v41 = vpack.c.bf16 %v268_v37, %v266_v36 }
  0x1c   :  { %v738_v42 = vpack.c.bf16 %v273_v39, %v271_v38  ;;  %v270_v43 = vld [vmem:[#allocation2 + $0x80] sm:$0xff]  ;;  %v272_v44 = vld [vmem:[#allocation2 + $0x90] sm:$0xff]  ;;  %v275_v45 = vld [vmem:[#allocation2 + $0xa8] sm:$0xff] }
  0x1d   :  { %649 = vmatmul.mubr.msk.f32.vlgmr.msra.gmra.mrb[0].mxu0 %vm68_vm0, %v40_v23  ;;  %729 = vmatpush1.bf16.msra.mxu1 %v728_v27  ;;  %v277_v46 = vld [vmem:[#allocation2 + $0xb8] sm:$0xff]  ;;  %v740_v48 = vpack.c.bf16 %v272_v44, %v270_v43  ;;  %v274_v50 = vld [vmem:[#allocation2 + $0xa0] sm:$0xff]  ;;  %v276_v51 = vld [vmem:[#allocation2 + $0xb0] sm:$0xff] }
  0x1e   :  { %163 = vmatprep.mubr.f32.mxu0 %v849_v0  ;;  %731 = vmatprep.subr.bf16.mxu1 %v730_v28  ;;  %v43_v47 = vld [vmem:[%s1155_s0 + $0x18] sm:$0xff]  ;;  %v742_v49 = vpack.c.bf16 %v277_v46, %v275_v45  ;;  %v279_v52 = vld [vmem:[#allocation2 + $0xc8] sm:$0xff]  ;;  %v44_v54 = vld [vmem:[%s1155_s0 + $0x20] sm:$0xff]  ;;  %v744_v55 = vpack.c.bf16 %v276_v51, %v274_v50 }
  0x1f   :  { %v281_v53 = vld [vmem:[#allocation2 + $0xd8] sm:$0xff]  ;;  %v278_v57 = vld [vmem:[#allocation2 + $0xc0] sm:$0xff]  ;;  %v280_v58 = vld [vmem:[#allocation2 + $0xd0] sm:$0xff] }
  0x20   :  { %v746_v56 = vpack.c.bf16 %v281_v53, %v279_v52  ;;  %v283_v59 = vld [vmem:[#allocation2 + $0xe8] sm:$0xff]  ;;  %v285_v60 = vld [vmem:[#allocation2 + $0xf8] sm:$0xff]  ;;  %v748_v62 = vpack.c.bf16 %v280_v58, %v278_v57  ;;  %v282_v1 = vld [vmem:[#allocation2 + $0xe0] sm:$0xff] }
  0x21   :  { %650 = vmatmul.mubr.msk.f32.gmra.mrb[2].mxu0 %vm68_vm0, %v41_v33  ;;  %733 = vmatpush1.bf16.msra.mxu1 %v732_v34  ;;  %v45_v61 = vld [vmem:[%s1155_s0 + $0x28] sm:$0xff]  ;;  %v750_v63 = vpack.c.bf16 %v285_v60, %v283_v59  ;;  %v284_v2 = vld [vmem:[#allocation2 + $0xf0] sm:$0xff]  ;;  %v289_v4 = vld [vmem:[#allocation2 + $0x118] sm:$0xff] }
  0x22   :  { %169 = vmatprep.mubr.f32.mxu0 %v849_v0  ;;  %735 = vmatprep.subr.bf16.mxu1 %v734_v35  ;;  %v287_v3 = vld [vmem:[#allocation2 + $0x108] sm:$0xff]  ;;  %v46_v5 = vld [vmem:[%s1155_s0 + $0x30] sm:$0xff]  ;;  %v752_v6 = vpack.c.bf16 %v284_v2, %v282_v1  ;;  %v286_v8 = vld [vmem:[#allocation2 + $0x100] sm:$0xff] }
  0x23   :  { %v754_v7 = vpack.c.bf16 %v289_v4, %v287_v3  ;;  %v288_v9 = vld [vmem:[#allocation2 + $0x110] sm:$0xff]  ;;  %v291_v10 = vld [vmem:[#allocation2 + $0x128] sm:$0xff]  ;;  %v293_v11 = vld [vmem:[#allocation2 + $0x138] sm:$0xff] }
  0x24   :  { %v47_v12 = vld [vmem:[%s1155_s0 + $0x38] sm:$0xff]  ;;  %v756_v13 = vpack.c.bf16 %v288_v9, %v286_v8  ;;  %v758_v14 = vpack.c.bf16 %v293_v11, %v291_v10  ;;  %v290_v15 = vld [vmem:[#allocation2 + $0x120] sm:$0xff]  ;;  %v292_v16 = vld [vmem:[#allocation2 + $0x130] sm:$0xff] }
  0x25   :  { %651 = vmatmul.mubr.msk.f32.gmra.mrb[4].mxu0 %vm68_vm0, %v42_v40  ;;  %737 = vmatpush1.bf16.msra.mxu1 %v736_v41  ;;  %v295_v17 = vld [vmem:[#allocation2 + $0x148] sm:$0xff]  ;;  %v297_v18 = vld [vmem:[#allocation2 + $0x158] sm:$0xff]  ;;  %v760_v19 = vpack.c.bf16 %v292_v16, %v290_v15  ;;  %v294_v21 = vld [vmem:[#allocation2 + $0x140] sm:$0xff] }
  0x26   :  { %175 = vmatprep.mubr.f32.mxu0 %v849_v0  ;;  %739 = vmatprep.subr.bf16.mxu1 %v738_v42  ;;  %v762_v20 = vpack.c.bf16 %v297_v18, %v295_v17  ;;  %v299_v22 = vld [vmem:[#allocation2 + $0x168] sm:$0xff]  ;;  %v301_v23 = vld [vmem:[#allocation2 + $0x178] sm:$0xff]  ;;  %v298_v26 = vld [vmem:[#allocation2 + $0x160] sm:$0xff] }
  0x27   :  { %v766_v25 = vpack.c.bf16 %v301_v23, %v299_v22  ;;  %v300_v27 = vld [vmem:[#allocation2 + $0x170] sm:$0xff]  ;;  %v303_v28 = vld [vmem:[#allocation2 + $0x188] sm:$0xff]  ;;  %v305_v29 = vld [vmem:[#allocation2 + $0x198] sm:$0xff] }
  0x28   :  { %v768_v30 = vpack.c.bf16 %v300_v27, %v298_v26  ;;  %v770_v31 = vpack.c.bf16 %v305_v29, %v303_v28  ;;  %v302_v32 = vld [vmem:[#allocation2 + $0x180] sm:$0xff]  ;;  %v304_v33 = vld [vmem:[#allocation2 + $0x190] sm:$0xff]  ;;  %v307_v34 = vld [vmem:[#allocation2 + $0x1a8] sm:$0xff]  ;;  %v58_v28 = vlaneseq }
  0x29   :  { %652 = vmatmul.mubr.msk.f32.gmra.mrb[6].mxu0 %vm68_vm0, %v43_v47  ;;  %741 = vmatpush1.bf16.msra.mxu1 %v740_v48  ;;  %v309_v35 = vld [vmem:[#allocation2 + $0x1b8] sm:$0xff]  ;;  %v772_v36 = vpack.c.bf16 %v304_v33, %v302_v32  ;;  %v306_v38 = vld [vmem:[#allocation2 + $0x1a0] sm:$0xff]  ;;  %v308_v39 = vld [vmem:[#allocation2 + $0x1b0] sm:$0xff] }
  0x2a   :  { %181 = vmatprep.mubr.f32.mxu0 %v849_v0  ;;  %743 = vmatprep.subr.bf16.mxu1 %v742_v49  ;;  %v774_v37 = vpack.c.bf16 %v309_v35, %v307_v34  ;;  %v776_v40 = vpack.c.bf16 %v308_v39, %v306_v38  ;;  %v311_v41 = vld [vmem:[#allocation2 + $0x1c8] sm:$0xff]  ;;  %v313_v42 = vld [vmem:[#allocation2 + $0x1d8] sm:$0xff]  ;;  %v310_v44 = vld [vmem:[#allocation2 + $0x1c0] sm:$0xff]  ;;  %v1044_v29 = vshrl.u32 %v58_v28, 7 }
  0x2b   :  { %v778_v43 = vpack.c.bf16 %v313_v42, %v311_v41  ;;  %v312_v45 = vld [vmem:[#allocation2 + $0x1d0] sm:$0xff]  ;;  %v315_v47 = vld [vmem:[#allocation2 + $0x1e8] sm:$0xff]  ;;  %v317_v48 = vld [vmem:[#allocation2 + $0x1f8] sm:$0xff] }
  0x2c   :  { %v780_v46 = vpack.c.bf16 %v312_v45, %v310_v44  ;;  %v782_v49 = vpack.c.bf16 %v317_v48, %v315_v47  ;;  %v314_v50 = vld [vmem:[#allocation2 + $0x1e0] sm:$0xff]  ;;  %v316_v51 = vld [vmem:[#allocation2 + $0x1f0] sm:$0xff]  ;;  %v492_v57 = vld [vmem:[%s1160_s5 + $0x8] sm:$0xff]  ;;  %v64_v32 = vsub.s32 1, %v1044_v29 }
  0x2d   :  { %653 = vmatmul.mubr.msk.f32.gmra.mrb[8].mxu0 %vm68_vm0, %v44_v54  ;;  %745 = vmatpush1.bf16.msra.mxu1 %v744_v55  ;;  %v784_v52 = vpack.c.bf16 %v316_v51, %v314_v50  ;;  %v507_v53 = vld [vmem:[%s1160_s5 + $0x80] sm:$0xff]  ;;  %v508_v54 = vld [vmem:[%s1160_s5 + $0x88] sm:$0xff]  ;;  %v509_v58 = vld [vmem:[%s1160_s5 + $0x90] sm:$0xff] }
  0x2e   :  { %187 = vmatprep.mubr.f32.mxu0 %v849_v0  ;;  %747 = vmatprep.subr.bf16.mxu1 %v746_v56  ;;  %v491_v55 = vld [vmem:[%s1160_s5] sm:$0xff]  ;;  %v786_v56 = vpack.c.bf16 %v508_v54, %v507_v53  ;;  %v510_v59 = vld [vmem:[%s1160_s5 + $0x98] sm:$0xff]  ;;  %v512_v2 = vld [vmem:[%s1160_s5 + $0xa8] sm:$0xff] }
  0x2f   :  { %v788_v60 = vpack.c.bf16 %v492_v57, %v491_v55  ;;  %v511_v1 = vld [vmem:[%s1160_s5 + $0xa0] sm:$0xff]  ;;  %v514_v8 = vld [vmem:[%s1160_s5 + $0xb8] sm:$0xff]  ;;  %v497_v11 = vld [vmem:[%s1160_s5 + $0x30] sm:$0xff] }
  0x30   :  { %787 = vmatprep.subr.bf16.mxu0 %v786_v56  ;;  %v794_v4 = vpack.c.bf16 %v512_v2, %v511_v1  ;;  %v499_v17 = vld [vmem:[%s1160_s5 + $0x40] sm:$0xff]  ;;  %v500_v18 = vld [vmem:[%s1160_s5 + $0x48] sm:$0xff]  ;;  %v501_v22 = vld [vmem:[%s1160_s5 + $0x50] sm:$0xff] }
  0x31   :  { %654 = vmatmul.mubr.msk.f32.gmra.mrb[10].mxu0 %vm68_vm0, %v45_v61  ;;  %749 = vmatpush1.bf16.msra.mxu1 %v748_v62  ;;  %v790_v61 = vpack.c.bf16 %v510_v59, %v509_v58  ;;  %v493_v62 = vld [vmem:[%s1160_s5 + $0x10] sm:$0xff]  ;;  %v502_v23 = vld [vmem:[%s1160_s5 + $0x58] sm:$0xff] }
  0x32   :  { %193 = vmatprep.mubr.f32.mxu0 %v849_v0  ;;  %751 = vmatprep.subr.bf16.mxu1 %v750_v63  ;;  %v494_v63 = vld [vmem:[%s1160_s5 + $0x18] sm:$0xff]  ;;  %v808_v26 = vpack.c.bf16 %v502_v23, %v501_v22 }
  0x33   :  { %789 = vmatpush3.bf16.msra.mxu0 %v788_v60  ;;  %v792_v3 = vpack.c.bf16 %v494_v63, %v493_v62 }
  0x34   :  { %791 = vmatprep.subr.bf16.mxu0 %v790_v61 }
  0x35   :  { %655 = vmatmul.mubr.msk.f32.gmra.mrb[12].mxu0 %vm68_vm0, %v46_v5  ;;  %753 = vmatpush1.bf16.msra.mxu1 %v752_v6  ;;  %v495_v5 = vld [vmem:[%s1160_s5 + $0x20] sm:$0xff]  ;;  %v496_v6 = vld [vmem:[%s1160_s5 + $0x28] sm:$0xff] }
  0x36   :  { %199 = vmatprep.mubr.f32.mxu0 %v849_v0  ;;  %755 = vmatprep.subr.bf16.mxu1 %v754_v7  ;;  %v296_v0 = vld [vmem:[#allocation2 + $0x150] sm:$0xff]  ;;  %v796_v9 = vpack.c.bf16 %v496_v6, %v495_v5 }
  0x37   :  { %v764_v24 = vpack.c.bf16 %v296_v0, %v294_v21  ;;  %v513_v7 = vld [vmem:[%s1160_s5 + $0xb0] sm:$0xff]  ;;  %793 = vmatpush3.bf16.msra.mxu0 %v792_v3  ;;  %v804_v21 = vpack.c.bf16 %v500_v18, %v499_v17 }
  0x38   :  { %795 = vmatprep.subr.bf16.mxu0 %v794_v4  ;;  %v798_v10 = vpack.c.bf16 %v514_v8, %v513_v7 }
  0x39   :  { %656 = vmatmul.mubr.msk.f32.gmra.mrb[14].mxu0 %vm68_vm0, %v47_v12  ;;  %757 = vmatpush1.bf16.msra.mxu1 %v756_v13  ;;  %v498_v12 = vld [vmem:[%s1160_s5 + $0x38] sm:$0xff]  ;;  %v515_v13 = vld [vmem:[%s1160_s5 + $0xc0] sm:$0xff] }
  0x3a   :  { %759 = vmatprep.subr.bf16.mxu1 %v758_v14  ;;  %v516_v14 = vld [vmem:[%s1160_s5 + $0xc8] sm:$0xff]  ;;  %v800_v15 = vpack.c.bf16 %v498_v12, %v497_v11 }
  0x3b   :  { %797 = vmatpush3.bf16.msra.mxu0 %v796_v9  ;;  %v802_v16 = vpack.c.bf16 %v516_v14, %v515_v13 }
  0x3c   :  { %799 = vmatprep.subr.bf16.mxu0 %v798_v10 }
  0x3d   :  { %761 = vmatpush1.bf16.msra.mxu1 %v760_v19  ;;  %v517_v19 = vld [vmem:[%s1160_s5 + $0xd0] sm:$0xff] }
  0x3e   :  { %763 = vmatprep.subr.bf16.mxu1 %v762_v20  ;;  %v518_v20 = vld [vmem:[%s1160_s5 + $0xd8] sm:$0xff] }
  0x3f   :  { %801 = vmatpush3.bf16.msra.mxu0 %v800_v15  ;;  %v806_v0 = vpack.c.bf16 %v518_v20, %v517_v19 }
  0x40   :  { %803 = vmatprep.subr.bf16.mxu0 %v802_v16 }
  0x41   :  { %765 = vmatpush1.bf16.msra.mxu1 %v764_v24  ;;  %v519_v24 = vld [vmem:[%s1160_s5 + $0xe0] sm:$0xff] }
  0x42   :  { %767 = vmatprep.subr.bf16.mxu1 %v766_v25  ;;  %v520_v25 = vld [vmem:[%s1160_s5 + $0xe8] sm:$0xff] }
  0x43   :  { %805 = vmatpush3.bf16.msra.mxu0 %v804_v21  ;;  %v810_v27 = vpack.c.bf16 %v520_v25, %v519_v24 }
  0x44   :  { %807 = vmatprep.subr.bf16.mxu0 %v806_v0 }
  0x45   :  { %769 = vmatpush1.bf16.msra.mxu1 %v768_v30  ;;  %v60_v30 = vsub.s32 0, %v1044_v29 }
  0x46   :  { %771 = vmatprep.subr.bf16.mxu1 %v770_v31  ;;  %v56_v31 = vld [vmem:[%s1157_s2] sm:$0x3] }
  0x47   :  { %809 = vmatpush3.bf16.msra.mxu0 %v808_v26  ;;  %v1053_v33 = vrot.slane %v56_v31, %v60_v30  ;;  %v1057_v34 = vrot.slane %v56_v31, %v64_v32 }
  0x48   :  { %811 = vmatprep.subr.bf16.mxu0 %v810_v27 }
  0x49   :  { %773 = vmatpush1.bf16.msra.mxu1 %v772_v36 }
  0x4a   :  { %775 = vmatprep.subr.bf16.mxu1 %v774_v37 }
  0x4d   :  { %777 = vmatpush1.bf16.msra.mxu1 %v776_v40 }
  0x4e   :  { %779 = vmatprep.subr.bf16.mxu1 %v778_v43 }
  0x51   :  { %781 = vmatpush1.bf16.msra.mxu1 %v780_v46 }
  0x52   :  { %783 = vmatprep.subr.bf16.mxu1 %v782_v49 }
  0x55   :  { %785 = vmatpush1.bf16.msra.mxu1 %v784_v52 }
  0xf0   :  { %v159_v35 = vpop.f32.mrb[0].mxu0 }
  0xf1   :  { %v160_v36 = vadd.f32 %v159_v35, %v1053_v33  ;;  %v161_v37 = vpop.f32.mrb[1].mxu0 }
  0xf2   :  { %v162_v38 = vadd.f32 %v161_v37, %v1057_v34 }
  0xf3   :  { %v222_v39 = vmul.f32 0.01, %v160_v36  ;;  %vm206_vm2 = vcmp.gt.f32.partialorder %v160_v36, 0.0 }
  0xf4   :  { %v165_v40 = vpop.f32.mrb[2].mxu0  ;;  %vm207_vm1 = vcmp.gt.f32.partialorder %v162_v38, 0.0  ;;  %v223_v41 = vmul.f32 0.01, %v162_v38 }
  0xf5   :  { %v166_v42 = vadd.f32 %v165_v40, %v1053_v33  ;;  %v167_v43 = vpop.f32.mrb[3].mxu0  ;;  %v238_v47 = vsel %vm206_vm2, %v160_v36, %v222_v39  ;;  %v503_v40 = vld [vmem:[%s1160_s5 + $0x60] sm:$0xff] }
  0xf6   :  { %v168_v44 = vadd.f32 %v167_v43, %v1057_v34  ;;  %v239_v45 = vsel %vm207_vm1, %v162_v38, %v223_v41  ;;  %v521_v41 = vld [vmem:[%s1160_s5 + $0xf0] sm:$0xff] }
  0xf7   :  { %v224_v46 = vmul.f32 0.01, %v166_v42  ;;  %394 = vmatprep.mubr.f32.mxu1 %v239_v45  ;;  %vm208_vm4 = vcmp.gt.f32.partialorder %v166_v42, 0.0  ;;  %v506_v45 = vld [vmem:[%s1160_s5 + $0x78] sm:$0xff] }
  0xf8   :  { %v225_v48 = vmul.f32 0.01, %v168_v44  ;;  %v171_v49 = vpop.f32.mrb[4].mxu0  ;;  %395 = vmatmul.mubr.f32.vlgmr.msra.gmra.mrb[0].mxu1 %v238_v47  ;;  %vm209_vm3 = vcmp.gt.f32.partialorder %v168_v44, 0.0  ;;  %v318_v47 = vld [vmem:[%s1159_s4] sm:$0x3] }
  0xf9   :  { %v172_v50 = vadd.f32 %v171_v49, %v1053_v33  ;;  %v173_v51 = vpop.f32.mrb[5].mxu0  ;;  %v240_v55 = vsel %vm208_vm4, %v166_v42, %v224_v46  ;;  %v522_v42 = vld [vmem:[%s1160_s5 + $0xf8] sm:$0xff]  ;;  %v1102_v49 = vrot.slane %v318_v47, %v64_v32 }
  0xfa   :  { %v174_v52 = vadd.f32 %v173_v51, %v1057_v34  ;;  %v241_v53 = vsel %vm209_vm3, %v168_v44, %v225_v48  ;;  %v814_v43 = vpack.c.bf16 %v522_v42, %v521_v41  ;;  %v505_v44 = vld [vmem:[%s1160_s5 + $0x70] sm:$0xff]  ;;  %v1098_v48 = vrot.slane %v318_v47, %v60_v30 }
  0xfb   :  { %v226_v54 = vmul.f32 0.01, %v172_v50  ;;  %400 = vmatprep.mubr.f32.mxu1 %v241_v53  ;;  %vm210_vm6 = vcmp.gt.f32.partialorder %v172_v50, 0.0  ;;  %v816_v46 = vpack.c.bf16 %v506_v45, %v505_v44 }
  0xfc   :  { %v227_v56 = vmul.f32 0.01, %v174_v52  ;;  %v177_v57 = vpop.f32.mrb[6].mxu0  ;;  %401 = vmatmul.mubr.f32.gmra.mrb[2].mxu1 %v240_v55  ;;  %vm211_vm5 = vcmp.gt.f32.partialorder %v174_v52, 0.0 }
  0xfd   :  { %v178_v58 = vadd.f32 %v177_v57, %v1053_v33  ;;  %v179_v59 = vpop.f32.mrb[7].mxu0  ;;  %v242_v63 = vsel %vm210_vm6, %v172_v50, %v226_v54 }
  0xfe   :  { %v180_v60 = vadd.f32 %v179_v59, %v1057_v34  ;;  %v243_v61 = vsel %vm211_vm5, %v174_v52, %v227_v56 }
  0xff   :  { %v228_v62 = vmul.f32 0.01, %v178_v58  ;;  %406 = vmatprep.mubr.f32.mxu1 %v243_v61  ;;  %vm212_vm8 = vcmp.gt.f32.partialorder %v178_v58, 0.0 }
 0x100   :  { %v229_v1 = vmul.f32 0.01, %v180_v60  ;;  %v183_v2 = vpop.f32.mrb[8].mxu0  ;;  %407 = vmatmul.mubr.f32.gmra.mrb[4].mxu1 %v242_v63  ;;  %vm213_vm7 = vcmp.gt.f32.partialorder %v180_v60, 0.0 }
 0x101   :  { %v184_v3 = vadd.f32 %v183_v2, %v1053_v33  ;;  %v185_v4 = vpop.f32.mrb[9].mxu0  ;;  %v244_v8 = vsel %vm212_vm8, %v178_v58, %v228_v62 }
 0x102   :  { %v186_v5 = vadd.f32 %v185_v4, %v1057_v34  ;;  %v245_v6 = vsel %vm213_vm7, %v180_v60, %v229_v1 }
 0x103   :  { %v230_v7 = vmul.f32 0.01, %v184_v3  ;;  %412 = vmatprep.mubr.f32.mxu1 %v245_v6  ;;  %vm214_vm10 = vcmp.gt.f32.partialorder %v184_v3, 0.0 }
 0x104   :  { %v231_v9 = vmul.f32 0.01, %v186_v5  ;;  %v189_v10 = vpop.f32.mrb[10].mxu0  ;;  %413 = vmatmul.mubr.f32.gmra.mrb[6].mxu1 %v244_v8  ;;  %vm215_vm9 = vcmp.gt.f32.partialorder %v186_v5, 0.0 }
 0x105   :  { %v190_v11 = vadd.f32 %v189_v10, %v1053_v33  ;;  %v191_v12 = vpop.f32.mrb[11].mxu0  ;;  %v246_v16 = vsel %vm214_vm10, %v184_v3, %v230_v7 }
 0x106   :  { %v192_v13 = vadd.f32 %v191_v12, %v1057_v34  ;;  %v247_v14 = vsel %vm215_vm9, %v186_v5, %v231_v9 }
 0x107   :  { %v232_v15 = vmul.f32 0.01, %v190_v11  ;;  %418 = vmatprep.mubr.f32.mxu1 %v247_v14  ;;  %vm216_vm12 = vcmp.gt.f32.partialorder %v190_v11, 0.0 }
 0x108   :  { %v233_v17 = vmul.f32 0.01, %v192_v13  ;;  %v195_v18 = vpop.f32.mrb[12].mxu0  ;;  %419 = vmatmul.mubr.f32.gmra.mrb[8].mxu1 %v246_v16  ;;  %vm217_vm11 = vcmp.gt.f32.partialorder %v192_v13, 0.0 }
 0x109   :  { %v196_v19 = vadd.f32 %v195_v18, %v1053_v33  ;;  %v197_v20 = vpop.f32.mrb[13].mxu0  ;;  %v248_v23 = vsel %vm216_vm12, %v190_v11, %v232_v15 }
 0x10a   :  { %v198_v21 = vadd.f32 %v197_v20, %v1057_v34  ;;  %v249_v0 = vsel %vm217_vm11, %v192_v13, %v233_v17 }
 0x10b   :  { %v234_v22 = vmul.f32 0.01, %v196_v19  ;;  %424 = vmatprep.mubr.f32.mxu1 %v249_v0  ;;  %vm218_vm14 = vcmp.gt.f32.partialorder %v196_v19, 0.0 }
 0x10c   :  { %v235_v24 = vmul.f32 0.01, %v198_v21  ;;  %v201_v25 = vpop.f32.mrb[14].mxu0  ;;  %425 = vmatmul.mubr.f32.gmra.mrb[10].mxu1 %v248_v23  ;;  %vm219_vm13 = vcmp.gt.f32.partialorder %v198_v21, 0.0 }
 0x10d   :  { %v202_v26 = vadd.f32 %v201_v25, %v1053_v33  ;;  %v203_v27 = vpop.f32.mrb[15].mxu0  ;;  %v250_v36 = vsel %vm218_vm14, %v196_v19, %v234_v22  ;;  %v504_v33 = vld [vmem:[%s1160_s5 + $0x68] sm:$0xff] }
 0x10e   :  { %v204_v28 = vadd.f32 %v203_v27, %v1057_v34  ;;  %v251_v31 = vsel %vm219_vm13, %v198_v21, %v235_v24  ;;  %v812_v34 = vpack.c.bf16 %v504_v33, %v503_v40 }
 0x10f   :  { %v236_v35 = vmul.f32 0.01, %v202_v26  ;;  %430 = vmatprep.mubr.f32.mxu1 %v251_v31  ;;  %vm220_vm0 = vcmp.gt.f32.partialorder %v202_v26, 0.0 }
 0x110   :  { %v237_v37 = vmul.f32 0.01, %v204_v28  ;;  %431 = vmatmul.mubr.f32.gmra.mrb[12].mxu1 %v250_v36  ;;  %vm221_vm15 = vcmp.gt.f32.partialorder %v204_v28, 0.0  ;;  %813 = vmatpush3.bf16.msra.mxu0 %v812_v34 }
 0x111   :  { %v252_v39 = vsel %vm220_vm0, %v202_v26, %v236_v35  ;;  %815 = vmatprep.subr.bf16.mxu0 %v814_v43 }
 0x112   :  { %v253_v38 = vsel %vm221_vm15, %v204_v28, %v237_v37 }
 0x113   :  { %436 = vmatprep.mubr.f32.mxu1 %v253_v38 }
 0x114   :  { %437 = vmatmul.mubr.f32.gmra.mrb[14].mxu1 %v252_v39  ;;  %817 = vmatpush3.bf16.msra.mxu0 %v816_v46 }
 0x1cb   :  { %v396_v50 = vpop.f32.mrb[0].mxu1 }
 0x1cc   :  { %v397_v51 = vadd.f32 %v396_v50, %v1098_v48  ;;  %v398_v52 = vpop.f32.mrb[1].mxu1 }
 0x1cd   :  { %v399_v53 = vadd.f32 %v398_v52, %v1102_v49 }
 0x1ce   :  { %v459_v54 = vmul.f32 0.01, %v397_v51  ;;  %vm443_vm1 = vcmp.gt.f32.partialorder %v397_v51, 0.0 }
 0x1cf   :  { %v460_v55 = vmul.f32 0.01, %v399_v53  ;;  %v402_v56 = vpop.f32.mrb[2].mxu1  ;;  %vm444_vm2 = vcmp.gt.f32.partialorder %v399_v53, 0.0 }
 0x1d0   :  { %v403_v57 = vadd.f32 %v402_v56, %v1098_v48  ;;  %v404_v58 = vpop.f32.mrb[3].mxu1  ;;  %v475_v29 = vsel %vm443_vm1, %v397_v51, %v459_v54  ;;  %vm635_vm1 = vcmask 130048  }
 0x1d1   :  { %v405_v30 = vadd.f32 %v404_v58, %v1102_v49  ;;  %v476_v59 = vsel %vm444_vm2, %v399_v53, %v460_v55 }
 0x1d2   :  { %v461_v32 = vmul.f32 0.01, %v403_v57  ;;  %594 = vmatprep.mubr.f32.mxu0 %v476_v59  ;;  %vm445_vm4 = vcmp.gt.f32.partialorder %v403_v57, 0.0 }
 0x1d3   :  { %v462_v60 = vmul.f32 0.01, %v405_v30  ;;  %v408_v61 = vpop.f32.mrb[4].mxu1  ;;  %595 = vmatmul.mubr.f32.vlgmr.msra.gmra.mrb[16].mxu0 %v475_v29  ;;  %vm446_vm3 = vcmp.gt.f32.partialorder %v405_v30, 0.0 }
 0x1d4   :  { %v409_v62 = vadd.f32 %v408_v61, %v1098_v48  ;;  %v410_v63 = vpop.f32.mrb[5].mxu1  ;;  %v477_v4 = vsel %vm445_vm4, %v403_v57, %v461_v32 }
 0x1d5   :  { %v411_v1 = vadd.f32 %v410_v63, %v1102_v49  ;;  %v478_v2 = vsel %vm446_vm3, %v405_v30, %v462_v60 }
 0x1d6   :  { %v463_v3 = vmul.f32 0.01, %v409_v62  ;;  %599 = vmatprep.mubr.f32.mxu0 %v478_v2  ;;  %vm447_vm6 = vcmp.gt.f32.partialorder %v409_v62, 0.0 }
 0x1d7   :  { %v464_v5 = vmul.f32 0.01, %v411_v1  ;;  %v414_v6 = vpop.f32.mrb[6].mxu1  ;;  %600 = vmatmul.mubr.f32.gmra.mrb[18].mxu0 %v477_v4  ;;  %vm448_vm5 = vcmp.gt.f32.partialorder %v411_v1, 0.0 }
 0x1d8   :  { %v415_v7 = vadd.f32 %v414_v6, %v1098_v48  ;;  %v416_v8 = vpop.f32.mrb[7].mxu1  ;;  %v479_v12 = vsel %vm447_vm6, %v409_v62, %v463_v3 }
 0x1d9   :  { %v417_v9 = vadd.f32 %v416_v8, %v1102_v49  ;;  %v480_v10 = vsel %vm448_vm5, %v411_v1, %v464_v5 }
 0x1da   :  { %v465_v11 = vmul.f32 0.01, %v415_v7  ;;  %604 = vmatprep.mubr.f32.mxu0 %v480_v10  ;;  %vm449_vm8 = vcmp.gt.f32.partialorder %v415_v7, 0.0 }
 0x1db   :  { %v466_v13 = vmul.f32 0.01, %v417_v9  ;;  %v420_v14 = vpop.f32.mrb[8].mxu1  ;;  %605 = vmatmul.mubr.f32.gmra.mrb[20].mxu0 %v479_v12  ;;  %vm450_vm7 = vcmp.gt.f32.partialorder %v417_v9, 0.0 }
 0x1dc   :  { %v421_v15 = vadd.f32 %v420_v14, %v1098_v48  ;;  %v422_v16 = vpop.f32.mrb[9].mxu1  ;;  %v481_v20 = vsel %vm449_vm8, %v415_v7, %v465_v11 }
 0x1dd   :  { %v423_v17 = vadd.f32 %v422_v16, %v1102_v49  ;;  %v482_v18 = vsel %vm450_vm7, %v417_v9, %v466_v13 }
 0x1de   :  { %v467_v19 = vmul.f32 0.01, %v421_v15  ;;  %609 = vmatprep.mubr.f32.mxu0 %v482_v18  ;;  %vm451_vm10 = vcmp.gt.f32.partialorder %v421_v15, 0.0 }
 0x1df   :  { %v468_v21 = vmul.f32 0.01, %v423_v17  ;;  %v426_v0 = vpop.f32.mrb[10].mxu1  ;;  %610 = vmatmul.mubr.f32.gmra.mrb[22].mxu0 %v481_v20  ;;  %vm452_vm9 = vcmp.gt.f32.partialorder %v423_v17, 0.0 }
 0x1e0   :  { %v427_v22 = vadd.f32 %v426_v0, %v1098_v48  ;;  %v428_v23 = vpop.f32.mrb[11].mxu1  ;;  %v483_v27 = vsel %vm451_vm10, %v421_v15, %v467_v19 }
 0x1e1   :  { %v429_v24 = vadd.f32 %v428_v23, %v1102_v49  ;;  %v484_v25 = vsel %vm452_vm9, %v423_v17, %v468_v21 }
 0x1e2   :  { %v469_v26 = vmul.f32 0.01, %v427_v22  ;;  %614 = vmatprep.mubr.f32.mxu0 %v484_v25  ;;  %vm453_vm12 = vcmp.gt.f32.partialorder %v427_v22, 0.0 }
 0x1e3   :  { %v470_v28 = vmul.f32 0.01, %v429_v24  ;;  %v432_v31 = vpop.f32.mrb[12].mxu1  ;;  %615 = vmatmul.mubr.f32.gmra.mrb[24].mxu0 %v483_v27  ;;  %vm454_vm11 = vcmp.gt.f32.partialorder %v429_v24, 0.0 }
 0x1e4   :  { %v433_v35 = vadd.f32 %v432_v31, %v1098_v48  ;;  %v434_v36 = vpop.f32.mrb[13].mxu1  ;;  %v485_v40 = vsel %vm453_vm12, %v427_v22, %v469_v26 }
 0x1e5   :  { %v435_v37 = vadd.f32 %v434_v36, %v1102_v49  ;;  %v486_v38 = vsel %vm454_vm11, %v429_v24, %v470_v28 }
 0x1e6   :  { %v471_v39 = vmul.f32 0.01, %v433_v35  ;;  %619 = vmatprep.mubr.f32.mxu0 %v486_v38  ;;  %vm455_vm14 = vcmp.gt.f32.partialorder %v433_v35, 0.0 }
 0x1e7   :  { %v472_v33 = vmul.f32 0.01, %v435_v37  ;;  %v438_v34 = vpop.f32.mrb[14].mxu1  ;;  %620 = vmatmul.mubr.f32.gmra.mrb[26].mxu0 %v485_v40  ;;  %vm456_vm13 = vcmp.gt.f32.partialorder %v435_v37, 0.0 }
 0x1e8   :  { %v439_v41 = vadd.f32 %v438_v34, %v1098_v48  ;;  %v440_v42 = vpop.f32.mrb[15].mxu1  ;;  %v487_v46 = vsel %vm455_vm14, %v433_v35, %v471_v39  ;;  %v657_v48 = vld [vmem:[%s1161_s6] ss:$0 sm:$0xff] }
 0x1e9   :  { %v441_v43 = vadd.f32 %v440_v42, %v1102_v49  ;;  %v488_v44 = vsel %vm456_vm13, %v435_v37, %v472_v33 }
 0x1ea   :  { %v473_v45 = vmul.f32 0.01, %v439_v41  ;;  %624 = vmatprep.mubr.f32.mxu0 %v488_v44  ;;  %vm457_vm0 = vcmp.gt.f32.partialorder %v439_v41, 0.0 }
 0x1eb   :  { %v474_v47 = vmul.f32 0.01, %v441_v43  ;;  %625 = vmatmul.mubr.f32.gmra.mrb[28].mxu0 %v487_v46  ;;  %vm458_vm15 = vcmp.gt.f32.partialorder %v441_v43, 0.0 }
 0x1ec   :  { %v489_v51 = vsel %vm457_vm0, %v439_v41, %v473_v45 }
 0x1ed   :  { %v490_v50 = vsel %vm458_vm15, %v441_v43, %v474_v47 }
 0x1ee   :  { %629 = vmatprep.mubr.f32.mxu0 %v490_v50 }
 0x1ef   :  { %630 = vmatmul.mubr.f32.gmra.mrb[30].mxu0 %v489_v51 }
 0x2a6   :  { %v690_v52 = vpop.f32.mrb[16].mxu0 }
 0x2a7   :  { %v691_v53 = vpop.f32.mrb[17].mxu0 }
 0x2a8   :  { %v692_v54 = vadd.f32 %v691_v53, %v690_v52 }
 0x2aa   :  { %v597_v49 = vadd.f32 %v692_v54, %v657_v48  ;;  %v693_v55 = vpop.f32.mrb[18].mxu0 }
 0x2ab   :  { %v694_v56 = vpop.f32.mrb[19].mxu0 }
 0x2ac   :  { %636 = vst.msk [vmem:[%s1162_s7] sm:$0xff] %vm635_vm1, %v597_v49  ;;  %v695_v57 = vadd.f32 %v694_v56, %v693_v55 }
 0x2ae   :  { %v602_v58 = vadd.f32 %v695_v57, %v657_v48  ;;  %v696_v30 = vpop.f32.mrb[20].mxu0 }
 0x2af   :  { %v697_v59 = vpop.f32.mrb[21].mxu0 }
 0x2b0   :  { %637 = vst.msk [vmem:[%s1162_s7 + $0x8] sm:$0xff] %vm635_vm1, %v602_v58  ;;  %v698_v29 = vadd.f32 %v697_v59, %v696_v30 }
 0x2b2   :  { %v607_v32 = vadd.f32 %v698_v29, %v657_v48  ;;  %v699_v60 = vpop.f32.mrb[22].mxu0 }
 0x2b3   :  { %v700_v61 = vpop.f32.mrb[23].mxu0 }
 0x2b4   :  { %638 = vst.msk [vmem:[%s1162_s7 + $0x10] sm:$0xff] %vm635_vm1, %v607_v32  ;;  %v701_v62 = vadd.f32 %v700_v61, %v699_v60 }
 0x2b6   :  { %v612_v63 = vadd.f32 %v701_v62, %v657_v48  ;;  %v702_v1 = vpop.f32.mrb[24].mxu0 }
 0x2b7   :  { %v703_v2 = vpop.f32.mrb[25].mxu0 }
 0x2b8   :  { %639 = vst.msk [vmem:[%s1162_s7 + $0x18] sm:$0xff] %vm635_vm1, %v612_v63  ;;  %v704_v3 = vadd.f32 %v703_v2, %v702_v1 }
 0x2ba   :  { %v617_v4 = vadd.f32 %v704_v3, %v657_v48  ;;  %v705_v5 = vpop.f32.mrb[26].mxu0 }
 0x2bb   :  { %v706_v6 = vpop.f32.mrb[27].mxu0 }
 0x2bc   :  { %640 = vst.msk [vmem:[%s1162_s7 + $0x20] sm:$0xff] %vm635_vm1, %v617_v4  ;;  %v707_v7 = vadd.f32 %v706_v6, %v705_v5 }
 0x2be   :  { %v622_v8 = vadd.f32 %v707_v7, %v657_v48  ;;  %v708_v9 = vpop.f32.mrb[28].mxu0 }
 0x2bf   :  { %v709_v10 = vpop.f32.mrb[29].mxu0 }
 0x2c0   :  { %641 = vst.msk [vmem:[%s1162_s7 + $0x28] sm:$0xff] %vm635_vm1, %v622_v8  ;;  %v710_v11 = vadd.f32 %v709_v10, %v708_v9 }
 0x2c2   :  { %v627_v12 = vadd.f32 %v710_v11, %v657_v48  ;;  %v711_v13 = vpop.f32.mrb[30].mxu0 }
 0x2c3   :  { %v712_v14 = vpop.f32.mrb[31].mxu0 }
 0x2c4   :  { %642 = vst.msk [vmem:[%s1162_s7 + $0x30] sm:$0xff] %vm635_vm1, %v627_v12  ;;  %v713_v15 = vadd.f32 %v712_v14, %v711_v13 }
 0x2c6   :  { %v632_v16 = vadd.f32 %v713_v15, %v657_v48 }
 0x2c8   :  { %643 = vst.msk [vmem:[%s1162_s7 + $0x38] sm:$0xff] %vm635_vm1, %v632_v16 }
 0x2c9   :  { %648 = vsyncpa [#allocation3], 1 }

</bundles_post_ra>
